<compile_context>
chip_gen: v6e
topology: v6e:2x2x1
jax: 0.10.0
libtpu: 0.0.40
codegen_flags: <defaults>
</compile_context>

<pallas_src>
import math
import functools

import jax
import jax.numpy as jnp
from jax import lax
from jax.experimental import pallas as pl
from jax.experimental.pallas import tpu as pltpu


def mha_kernel(x_ref, wqkv_ref, bqkv_ref, wo_ref, bo_ref,
               out_ref, attn_ref, acc_ref):
    """One grid step = one (batch, q-tile, head) cell.

    x_ref:    (1, S, H)        full sequence for this batch element
    wqkv_ref: (1, 3, H, hd)    pre-transposed per-head [Wq|Wk|Wv] slices
    bqkv_ref: (1, 3, hd)       per-head q/k/v biases (f32)
    wo_ref:   (1, hd, H)       per-head rows of Wout.T
    bo_ref:   (1, H)           output bias (f32)
    out_ref:  (1, TQ, H)       output tile (accumulated over the head axis)
    attn_ref: (1, 1, TQ, S)    per-head attention weights tile
    acc_ref:  (TQ, H) f32      VMEM accumulator for the output projection
    """
    qi = pl.program_id(1)
    h = pl.program_id(2)
    num_heads = pl.num_programs(2)

    tq = out_ref.shape[1]
    head_dim = wo_ref.shape[1]
    scale = 1.0 / math.sqrt(head_dim)
    cdt = wqkv_ref.dtype               # compute dtype for MXU operands (f32 or bf16)

    x = x_ref[0]                                        # (S, H)
    q_start = pl.multiple_of(qi * tq, tq)
    x_q = x_ref[0, pl.ds(q_start, tq), :]               # (TQ, H)

    w_q = wqkv_ref[0, 0]                                # (H, hd)  already (in, out)
    w_k = wqkv_ref[0, 1]
    w_v = wqkv_ref[0, 2]
    b_all = bqkv_ref[0]                                 # (3, hd) f32

    # ---- per-head projections (2-D MXU matmuls, f32 accumulation) ----
    q = jnp.dot(x_q, w_q, preferred_element_type=jnp.float32) + b_all[0:1, :]  # (TQ, hd)
    k = jnp.dot(x,   w_k, preferred_element_type=jnp.float32) + b_all[1:2, :]  # (S, hd)
    v = jnp.dot(x,   w_v, preferred_element_type=jnp.float32) + b_all[2:3, :]  # (S, hd)

    # ---- scaled dot-product attention, scores (TQ, S) ----
    # contract over head_dim without an explicit transpose of k
    scores = lax.dot_general(
        q.astype(cdt), k.astype(cdt),
        dimension_numbers=(((1,), (1,)), ((), ())),
        preferred_element_type=jnp.float32) * scale

    m = jnp.max(scores, axis=-1, keepdims=True)
    e = jnp.exp(scores - m)
    denom = jnp.sum(e, axis=-1, keepdims=True)
    attn = e * pl.reciprocal(denom, approx=True)        # (TQ, S) f32, EUP reciprocal

    # TODO(synk): attention dropout omitted (eval-mode / identity behavior).
    attn_ref[0, 0] = attn.astype(attn_ref.dtype)

    # context for this head: (TQ, hd)
    context = jnp.dot(attn.astype(cdt), v.astype(cdt),
                      preferred_element_type=jnp.float32)

    # ---- output projection, accumulated over the head (reduction) axis ----
    @pl.when(h == 0)
    def _():
        acc_ref[...] = jnp.zeros_like(acc_ref)

    acc_ref[...] += jnp.dot(context.astype(cdt), wo_ref[0],
                            preferred_element_type=jnp.float32)

    @pl.when(h == num_heads - 1)
    def _():
        out_ref[0] = (acc_ref[...] + bo_ref[...]).astype(out_ref.dtype)


def _pick_q_tile(S):
    for cand in (256, 128):
        if S % cand == 0:
            return cand
    return S


def pack_params(params, num_heads):
    """Pre-transpose nn.Linear weights and pack them per head (host-side, free)."""
    wq, bq, wk, bk, wv, bv, wo, bo = params
    H = wq.shape[0]
    hd = H // num_heads

    def per_head_cols(w):
        # w: (out=H, in=H)  ->  w.T: (in=H, out=H)  ->  (nh, H, hd) per-head column blocks
        return jnp.transpose(w.T.reshape(H, num_heads, hd), (1, 0, 2))

    wqkv = jnp.stack([per_head_cols(wq), per_head_cols(wk), per_head_cols(wv)],
                     axis=1)                                         # (nh, 3, H, hd)
    bqkv = jnp.stack([bq.reshape(num_heads, hd),
                      bk.reshape(num_heads, hd),
                      bv.reshape(num_heads, hd)], axis=1)            # (nh, 3, hd)
    wo_h = wo.T.reshape(num_heads, hd, H)                            # (nh, hd, H)
    bo2 = bo.reshape(1, H)                                           # (1, H)
    return wqkv, bqkv, wo_h, bo2


def multi_head_attention(x, params, *, num_heads, compute_dtype=None,
                         attn_dtype=jnp.float32, q_tile=None):
    B, S, H = x.shape
    head_dim = H // num_heads
    assert head_dim * num_heads == H

    wqkv, bqkv, wo_h, bo2 = pack_params(params, num_heads)
    if compute_dtype is not None:
        # bf16 fast path for v6e/v7x MXU; biases & softmax stay f32.
        x = x.astype(compute_dtype)
        wqkv = wqkv.astype(compute_dtype)
        wo_h = wo_h.astype(compute_dtype)

    tq = q_tile if q_tile is not None else _pick_q_tile(S)
    assert S % tq == 0
    n_qt = S // tq
    grid = (B, n_qt, num_heads)

    out, attn = pl.pallas_call(
        mha_kernel,
        out_shape=(
            jax.ShapeDtypeStruct((B, S, H), x.dtype),
            jax.ShapeDtypeStruct((B, num_heads, S, S), attn_dtype),
        ),
        grid_spec=pltpu.PrefetchScalarGridSpec(
            num_scalar_prefetch=0,
            grid=grid,
            in_specs=[
                pl.BlockSpec((1, S, H), lambda b, qi, h: (b, 0, 0)),        # x
                pl.BlockSpec((1, 3, H, head_dim),
                             lambda b, qi, h: (h, 0, 0, 0)),                # fused Wqkv (per head)
                pl.BlockSpec((1, 3, head_dim), lambda b, qi, h: (h, 0, 0)), # fused bqkv
                pl.BlockSpec((1, head_dim, H), lambda b, qi, h: (h, 0, 0)), # Wout.T rows (per head)
                pl.BlockSpec((1, H), lambda b, qi, h: (0, 0)),              # bout
            ],
            out_specs=[
                pl.BlockSpec((1, tq, H), lambda b, qi, h: (b, qi, 0)),        # output (head-reduced)
                pl.BlockSpec((1, 1, tq, S), lambda b, qi, h: (b, h, qi, 0)),  # attn weights
            ],
            scratch_shapes=[pltpu.VMEM((tq, H), jnp.float32)],
        ),
        compiler_params=pltpu.CompilerParams(
            dimension_semantics=("parallel", "parallel", "arbitrary")),
    )(x, wqkv, bqkv, wo_h, bo2)
    return out, attn


def init_linear_params(key, hidden_size):
    """Deterministic nn.Linear-style init: U(-1/sqrt(in), 1/sqrt(in))."""
    bound = 1.0 / math.sqrt(hidden_size)
    kw, kb = jax.random.split(key)
    w = jax.random.uniform(kw, (hidden_size, hidden_size),
                           minval=-bound, maxval=bound, dtype=jnp.float32)
    b = jax.random.uniform(kb, (hidden_size,),
                           minval=-bound, maxval=bound, dtype=jnp.float32)
    return w, b


def reference_mha(x, params, num_heads):
    """Pure-JAX reference (mirrors the PyTorch forward)."""
    wq, bq, wk, bk, wv, bv, wo, bo = params
    B, S, H = x.shape
    hd = H // num_heads
    q = (x @ wq.T + bq).reshape(B, S, num_heads, hd).transpose(0, 2, 1, 3)
    k = (x @ wk.T + bk).reshape(B, S, num_heads, hd).transpose(0, 2, 1, 3)
    v = (x @ wv.T + bv).reshape(B, S, num_heads, hd).transpose(0, 2, 1, 3)
    scores = jnp.einsum('bnqd,bnkd->bnqk', q, k) / math.sqrt(hd)
    attn = jax.nn.softmax(scores, axis=-1)
    ctx = jnp.einsum('bnqk,bnkd->bnqd', attn, v)
    ctx = ctx.transpose(0, 2, 1, 3).reshape(B, S, H)
    out = ctx @ wo.T + bo
    return out, attn


if __name__ == "__main__":
    B, S, H = 2, 8, 32
    num_heads = 4

    key = jax.random.PRNGKey(0)
    kx, kq, kk, kv, ko = jax.random.split(key, 5)

    x = jax.random.normal(kx, (B, S, H), dtype=jnp.float32)
    wq, bq = init_linear_params(kq, H)
    wk, bk = init_linear_params(kk, H)
    wv, bv = init_linear_params(kv, H)
    wo, bo = init_linear_params(ko, H)
    params = (wq, bq, wk, bk, wv, bv, wo, bo)

    ref_out, ref_attn = reference_mha(x, params, num_heads)

    # f32 path
    out, attn = multi_head_attention(x, params, num_heads=num_heads)
    out = jax.block_until_ready(out)
    attn = jax.block_until_ready(attn)
    assert out.shape == (B, S, H)
    assert attn.shape == (B, num_heads, S, S)
    assert jnp.allclose(out, ref_out, atol=5e-3, rtol=5e-3)
    assert jnp.allclose(attn, ref_attn, atol=5e-3, rtol=5e-3)

    # bf16 compute path (v6e/v7x MXU fast path; attn writeback halved)
    out16, attn16 = multi_head_attention(x, params, num_heads=num_heads,
                                         compute_dtype=jnp.bfloat16,
                                         attn_dtype=jnp.bfloat16)
    out16 = jax.block_until_ready(out16)
    attn16 = jax.block_until_ready(attn16)
    assert jnp.allclose(out16.astype(jnp.float32), ref_out, atol=5e-2, rtol=5e-2)
    assert jnp.allclose(attn16.astype(jnp.float32), ref_attn, atol=3e-2, rtol=3e-2)

    print("KERNEL_OK")
</pallas_src>

<mosaic_0001>
module attributes {stable_mosaic.version = 11 : i64} {
  func.func @mha_kernel(%arg0: i32, %arg1: i32, %arg2: i32, %arg3: memref<1x8x32xf32, #tpu.memory_space<vmem>>, %arg4: memref<1x3x32x8xf32, #tpu.memory_space<vmem>>, %arg5: memref<1x3x8xf32, #tpu.memory_space<vmem>>, %arg6: memref<1x8x32xf32, #tpu.memory_space<vmem>>, %arg7: memref<1x32xf32, #tpu.memory_space<vmem>>, %arg8: memref<1x8x32xf32, #tpu.memory_space<vmem>>, %arg9: memref<1x1x8x8xf32, #tpu.memory_space<vmem>>, %arg10: memref<8x32xf32, #tpu.memory_space<vmem>>) attributes {dimension_semantics = [#tpu.dimension_semantics<parallel>, #tpu.dimension_semantics<parallel>, #tpu.dimension_semantics<arbitrary>], iteration_bounds = array<i64: 2, 1, 4>, scalar_prefetch = 0 : i64, scratch_operands = 1 : i64, tpu.core_type = #tpu.core_type<tc>, window_params = [{transform_indices = @transform_0, window_bounds = array<i64: 1, 8, 32>}, {transform_indices = @transform_1, window_bounds = array<i64: 1, 3, 32, 8>}, {transform_indices = @transform_2, window_bounds = array<i64: 1, 3, 8>}, {transform_indices = @transform_3, window_bounds = array<i64: 1, 8, 32>}, {pipeline_mode = #tpu.pipeline_mode<synchronous>, transform_indices = @transform_4, window_bounds = array<i64: 1, 32>}, {transform_indices = @transform_5, window_bounds = array<i64: 1, 8, 32>}, {transform_indices = @transform_6, window_bounds = array<i64: 1, 1, 8, 8>}]} {
    %c0 = arith.constant 0 : index
    %c0_0 = arith.constant 0 : index
    %c0_1 = arith.constant 0 : index
    %0 = vector.load %arg3[%c0, %c0_0, %c0_1] : memref<1x8x32xf32, #tpu.memory_space<vmem>>, vector<1x8x32xf32>
    %1 = vector.shape_cast %0 : vector<1x8x32xf32> to vector<8x32xf32>
    %c8_i32 = arith.constant 8 : i32
    %2 = arith.muli %arg1, %c8_i32 : i32
    %3 = tpu.assume_multiple %2, 8 : i32
    %c0_2 = arith.constant 0 : index
    %4 = arith.index_cast %3 : i32 to index
    %c0_3 = arith.constant 0 : index
    %5 = vector.load %arg3[%c0_2, %4, %c0_3] : memref<1x8x32xf32, #tpu.memory_space<vmem>>, vector<1x8x32xf32>
    %6 = vector.shape_cast %5 : vector<1x8x32xf32> to vector<8x32xf32>
    %c0_4 = arith.constant 0 : index
    %c0_5 = arith.constant 0 : index
    %c0_6 = arith.constant 0 : index
    %c0_7 = arith.constant 0 : index
    %7 = vector.load %arg4[%c0_4, %c0_5, %c0_6, %c0_7] : memref<1x3x32x8xf32, #tpu.memory_space<vmem>>, vector<1x1x32x8xf32>
    %8 = vector.shape_cast %7 : vector<1x1x32x8xf32> to vector<32x8xf32>
    %c0_8 = arith.constant 0 : index
    %c1 = arith.constant 1 : index
    %c0_9 = arith.constant 0 : index
    %c0_10 = arith.constant 0 : index
    %9 = vector.load %arg4[%c0_8, %c1, %c0_9, %c0_10] : memref<1x3x32x8xf32, #tpu.memory_space<vmem>>, vector<1x1x32x8xf32>
    %10 = vector.shape_cast %9 : vector<1x1x32x8xf32> to vector<32x8xf32>
    %c0_11 = arith.constant 0 : index
    %c2 = arith.constant 2 : index
    %c0_12 = arith.constant 0 : index
    %c0_13 = arith.constant 0 : index
    %11 = vector.load %arg4[%c0_11, %c2, %c0_12, %c0_13] : memref<1x3x32x8xf32, #tpu.memory_space<vmem>>, vector<1x1x32x8xf32>
    %12 = vector.shape_cast %11 : vector<1x1x32x8xf32> to vector<32x8xf32>
    %c0_14 = arith.constant 0 : index
    %c0_15 = arith.constant 0 : index
    %c0_16 = arith.constant 0 : index
    %13 = vector.load %arg5[%c0_14, %c0_15, %c0_16] : memref<1x3x8xf32, #tpu.memory_space<vmem>>, vector<1x3x8xf32>
    %14 = vector.shape_cast %13 : vector<1x3x8xf32> to vector<3x8xf32>
    %cst = arith.constant dense<0.000000e+00> : vector<8x8xf32>
    %15 = tpu.matmul %6, %8, %cst {dimension_numbers = #tpu.dot_dimension_numbers<[1], [0], [0], [1], [0, 0, 1, 1], [], []>} : vector<8x32xf32>, vector<32x8xf32>, vector<8x8xf32> -> vector<8x8xf32>
    %16 = vector.extract_strided_slice %14 {offsets = [0, 0], sizes = [1, 8], strides = [1, 1]} : vector<3x8xf32> to vector<1x8xf32>
    %17 = vector.broadcast %16 : vector<1x8xf32> to vector<8x8xf32>
    %18 = arith.addf %15, %17 : vector<8x8xf32>
    %cst_17 = arith.constant dense<0.000000e+00> : vector<8x8xf32>
    %19 = tpu.matmul %1, %10, %cst_17 {dimension_numbers = #tpu.dot_dimension_numbers<[1], [0], [0], [1], [0, 0, 1, 1], [], []>} : vector<8x32xf32>, vector<32x8xf32>, vector<8x8xf32> -> vector<8x8xf32>
    %20 = vector.extract_strided_slice %14 {offsets = [1, 0], sizes = [1, 8], strides = [1, 1]} : vector<3x8xf32> to vector<1x8xf32>
    %21 = vector.broadcast %20 : vector<1x8xf32> to vector<8x8xf32>
    %22 = arith.addf %19, %21 : vector<8x8xf32>
    %cst_18 = arith.constant dense<0.000000e+00> : vector<8x8xf32>
    %23 = tpu.matmul %1, %12, %cst_18 {dimension_numbers = #tpu.dot_dimension_numbers<[1], [0], [0], [1], [0, 0, 1, 1], [], []>} : vector<8x32xf32>, vector<32x8xf32>, vector<8x8xf32> -> vector<8x8xf32>
    %24 = vector.extract_strided_slice %14 {offsets = [2, 0], sizes = [1, 8], strides = [1, 1]} : vector<3x8xf32> to vector<1x8xf32>
    %25 = vector.broadcast %24 : vector<1x8xf32> to vector<8x8xf32>
    %26 = arith.addf %23, %25 : vector<8x8xf32>
    %cst_19 = arith.constant dense<0.000000e+00> : vector<8x8xf32>
    %27 = tpu.matmul %18, %22, %cst_19 {dimension_numbers = #tpu.dot_dimension_numbers<[1], [1], [0], [0], [0, 0, 1, 0], [], []>} : vector<8x8xf32>, vector<8x8xf32>, vector<8x8xf32> -> vector<8x8xf32>
    %cst_20 = arith.constant 0.353553385 : f32
    %28 = vector.broadcast %cst_20 : f32 to vector<8x8xf32>
    %29 = arith.mulf %27, %28 : vector<8x8xf32>
    %cst_21 = arith.constant dense<0xFF800000> : vector<8xf32>
    %30 = vector.multi_reduction <maximumf>, %29, %cst_21 [1] : vector<8x8xf32> to vector<8xf32>
    %31 = vector.shape_cast %30 : vector<8xf32> to vector<8x1xf32>
    %32 = vector.broadcast %31 : vector<8x1xf32> to vector<8x8xf32>
    %33 = arith.subf %29, %32 : vector<8x8xf32>
    %34 = math.exp %33 : vector<8x8xf32>
    %cst_22 = arith.constant dense<0.000000e+00> : vector<8xf32>
    %35 = vector.multi_reduction <add>, %34, %cst_22 [1] : vector<8x8xf32> to vector<8xf32>
    %36 = vector.shape_cast %35 : vector<8xf32> to vector<8x1xf32>
    %37 = tpu.reciprocal %36 {approx = true} : vector<8x1xf32> -> vector<8x1xf32>
    %38 = vector.broadcast %37 : vector<8x1xf32> to vector<8x8xf32>
    %39 = arith.mulf %34, %38 : vector<8x8xf32>
    %c0_23 = arith.constant 0 : index
    %c0_24 = arith.constant 0 : index
    %c0_25 = arith.constant 0 : index
    %c0_26 = arith.constant 0 : index
    %40 = vector.load %arg9[%c0_23, %c0_24, %c0_25, %c0_26] : memref<1x1x8x8xf32, #tpu.memory_space<vmem>>, vector<1x1x8x8xf32>
    %41 = vector.shape_cast %40 : vector<1x1x8x8xf32> to vector<8x8xf32>
    %42 = vector.shape_cast %39 : vector<8x8xf32> to vector<1x1x8x8xf32>
    tpu.vector_store %arg9[%c0_23, %c0_24, %c0_25, %c0_26], %42 {strides = array<i32>} : memref<1x1x8x8xf32, #tpu.memory_space<vmem>>, vector<1x1x8x8xf32>,
    %cst_27 = arith.constant dense<0.000000e+00> : vector<8x8xf32>
    %43 = tpu.matmul %39, %26, %cst_27 {dimension_numbers = #tpu.dot_dimension_numbers<[1], [0], [0], [1], [0, 0, 1, 1], [], []>} : vector<8x8xf32>, vector<8x8xf32>, vector<8x8xf32> -> vector<8x8xf32>
    %c0_i32 = arith.constant 0 : i32
    %44 = arith.cmpi eq, %arg2, %c0_i32 : i32
    %45 = arith.extui %44 : i1 to i32
    %c0_i32_28 = arith.constant 0 : i32
    %46 = arith.cmpi ne, %45, %c0_i32_28 : i32
    scf.if %46 {
      %cst_38 = arith.constant 0.000000e+00 : f32
      %56 = vector.broadcast %cst_38 : f32 to vector<8x32xf32>
      %c0_39 = arith.constant 0 : index
      %c0_40 = arith.constant 0 : index
      %57 = vector.load %arg10[%c0_39, %c0_40] : memref<8x32xf32, #tpu.memory_space<vmem>>, vector<8x32xf32>
      tpu.vector_store %arg10[%c0_39, %c0_40], %56 {strides = array<i32>} : memref<8x32xf32, #tpu.memory_space<vmem>>, vector<8x32xf32>,
    } else {
    }
    %c0_29 = arith.constant 0 : index
    %c0_30 = arith.constant 0 : index
    %47 = vector.load %arg10[%c0_29, %c0_30] : memref<8x32xf32, #tpu.memory_space<vmem>>, vector<8x32xf32>
    %c0_31 = arith.constant 0 : index
    %c0_32 = arith.constant 0 : index
    %c0_33 = arith.constant 0 : index
    %48 = vector.load %arg6[%c0_31, %c0_32, %c0_33] : memref<1x8x32xf32, #tpu.memory_space<vmem>>, vector<1x8x32xf32>
    %49 = vector.shape_cast %48 : vector<1x8x32xf32> to vector<8x32xf32>
    %cst_34 = arith.constant dense<0.000000e+00> : vector<8x32xf32>
    %50 = tpu.matmul %43, %49, %cst_34 {dimension_numbers = #tpu.dot_dimension_numbers<[1], [0], [0], [1], [0, 0, 1, 1], [], []>} : vector<8x8xf32>, vector<8x32xf32>, vector<8x32xf32> -> vector<8x32xf32>
    %51 = arith.addf %47, %50 : vector<8x32xf32>
    %c0_35 = arith.constant 0 : index
    %c0_36 = arith.constant 0 : index
    %52 = vector.load %arg10[%c0_35, %c0_36] : memref<8x32xf32, #tpu.memory_space<vmem>>, vector<8x32xf32>
    tpu.vector_store %arg10[%c0_35, %c0_36], %51 {strides = array<i32>} : memref<8x32xf32, #tpu.memory_space<vmem>>, vector<8x32xf32>,
    %c3_i32 = arith.constant 3 : i32
    %53 = arith.cmpi eq, %arg2, %c3_i32 : i32
    %54 = arith.extui %53 : i1 to i32
    %c0_i32_37 = arith.constant 0 : i32
    %55 = arith.cmpi ne, %54, %c0_i32_37 : i32
    scf.if %55 {
      %c0_38 = arith.constant 0 : index
      %c0_39 = arith.constant 0 : index
      %56 = vector.load %arg10[%c0_38, %c0_39] : memref<8x32xf32, #tpu.memory_space<vmem>>, vector<8x32xf32>
      %c0_40 = arith.constant 0 : index
      %c0_41 = arith.constant 0 : index
      %57 = vector.load %arg7[%c0_40, %c0_41] : memref<1x32xf32, #tpu.memory_space<vmem>>, vector<1x32xf32>
      %58 = vector.broadcast %57 : vector<1x32xf32> to vector<8x32xf32>
      %59 = arith.addf %56, %58 : vector<8x32xf32>
      %c0_42 = arith.constant 0 : index
      %c0_43 = arith.constant 0 : index
      %c0_44 = arith.constant 0 : index
      %60 = vector.load %arg8[%c0_42, %c0_43, %c0_44] : memref<1x8x32xf32, #tpu.memory_space<vmem>>, vector<1x8x32xf32>
      %61 = vector.shape_cast %60 : vector<1x8x32xf32> to vector<8x32xf32>
      %62 = vector.shape_cast %59 : vector<8x32xf32> to vector<1x8x32xf32>
      tpu.vector_store %arg8[%c0_42, %c0_43, %c0_44], %62 {strides = array<i32>} : memref<1x8x32xf32, #tpu.memory_space<vmem>>, vector<1x8x32xf32>,
    } else {
    }
    return
  }
  func.func @transform_0(%arg0: i32, %arg1: i32, %arg2: i32) -> (i32, i32, i32) {
    %c0_i32 = arith.constant 0 : i32
    %c0_i32_0 = arith.constant 0 : i32
    %c0_i32_1 = arith.constant 0 : i32
    return %arg0, %c0_i32, %c0_i32_0 : i32, i32, i32
  }
  func.func @transform_1(%arg0: i32, %arg1: i32, %arg2: i32) -> (i32, i32, i32, i32) {
    %c0_i32 = arith.constant 0 : i32
    %c0_i32_0 = arith.constant 0 : i32
    %c0_i32_1 = arith.constant 0 : i32
    %c0_i32_2 = arith.constant 0 : i32
    return %arg2, %c0_i32, %c0_i32_0, %c0_i32_1 : i32, i32, i32, i32
  }
  func.func @transform_2(%arg0: i32, %arg1: i32, %arg2: i32) -> (i32, i32, i32) {
    %c0_i32 = arith.constant 0 : i32
    %c0_i32_0 = arith.constant 0 : i32
    %c0_i32_1 = arith.constant 0 : i32
    return %arg2, %c0_i32, %c0_i32_0 : i32, i32, i32
  }
  func.func @transform_3(%arg0: i32, %arg1: i32, %arg2: i32) -> (i32, i32, i32) {
    %c0_i32 = arith.constant 0 : i32
    %c0_i32_0 = arith.constant 0 : i32
    %c0_i32_1 = arith.constant 0 : i32
    return %arg2, %c0_i32, %c0_i32_0 : i32, i32, i32
  }
  func.func @transform_4(%arg0: i32, %arg1: i32, %arg2: i32) -> (i32, i32) {
    %c0_i32 = arith.constant 0 : i32
    %c0_i32_0 = arith.constant 0 : i32
    %c0_i32_1 = arith.constant 0 : i32
    return %c0_i32, %c0_i32_0 : i32, i32
  }
  func.func @transform_5(%arg0: i32, %arg1: i32, %arg2: i32) -> (i32, i32, i32) {
    %c0_i32 = arith.constant 0 : i32
    %c0_i32_0 = arith.constant 0 : i32
    return %arg0, %arg1, %c0_i32 : i32, i32, i32
  }
  func.func @transform_6(%arg0: i32, %arg1: i32, %arg2: i32) -> (i32, i32, i32, i32) {
    %c0_i32 = arith.constant 0 : i32
    %c0_i32_0 = arith.constant 0 : i32
    return %arg0, %arg2, %arg1, %c0_i32 : i32, i32, i32, i32
  }
}

</mosaic_0001>

<bundles_post_ra>
// kernel: tpu_custom_call.1
= control target key start
LH: loop header
LB: loop body
LE: loop exit
PB: predicated region body
PF: predicated region fallthrough
CT: control target
= control target key end

     0   :  { %s1722_s0 = inlined_call_operand.vmem [shape: f32[2,8,32], index: 0, kind: input, shape index: {}]   ;;  %s1723_s1 = inlined_call_operand.vmem [shape: f32[4,3,32,8], index: 1, kind: input, shape index: {}]   ;;  %s1724_s2 = inlined_call_operand.vmem [shape: f32[4,3,8], index: 2, kind: input, shape index: {}]   ;;  %s1725_s3 = inlined_call_operand.vmem [shape: f32[4,8,32], index: 3, kind: input, shape index: {}]   ;;  %s1726_s4 = inlined_call_operand.vmem [shape: f32[1,32], index: 4, kind: input, shape index: {}]   ;;  %s1727_s5 = inlined_call_operand.hbm [shape: f32[2,8,32], index: 5, kind: output, shape index: {0}]   ;;  %s1728_s6 = inlined_call_operand.hbm [shape: f32[2,4,8,8], index: 6, kind: output, shape index: {1}]  }
   0x1   :  { %1737 = sst [smem:[#allocation15_spill]] %s1722_s0 }
   0x2   :  { %1738 = sst [smem:[#allocation16_spill]] %s1723_s1 }
   0x3   :  { %1739 = sst [smem:[#allocation17_spill]] %s1724_s2 }
   0x4   :  { %1740 = sst [smem:[#allocation18_spill]] %s1725_s3 }
   0x5   :  { %1741 = sst [smem:[#allocation19_spill]] %s1726_s4 }
   0x6   :  { %12 = vsyncpa [#allocation4], 0 }
   0x7   :  { %14 = vsyncpa [#allocation4 + $0x1], 0 }
   0x8   :  { %15 = vsyncpa [#allocation6], 0 }
   0x9   :  { %17 = vsyncpa [#allocation6 + $0x1], 0  ;;  %s1428_s21 = smov 0   ;;  %s1430_s22 = smov 0  }
   0xa   :  { %s1432_s23 = smov 0   ;;  %s1434_s24 = smov 0  }
   0xb   :  { %s1436_s25 = smov 0   ;;  %s1438_s26 = smov 0  }
   0xc   :  { %s1440_s27 = smov 0   ;;  %s1442_s28 = smov 0  }
   0xd   :  { %s1444_s29 = smov 0   ;;  %s1446_s30 = smov 0  }
   0xe   :  { %s1448_s7 = smov 0  }
   0xf LB: > { %1742 = sst [smem:[#allocation9_spill]] %s1366_s26  ;;  %s1027_s8 = sadd.s32 4294967295, %s1386_s7   ;;  %s1386_s7 = sphi %s1448_s7, %s23_s7   ;;  %s1382_s30 = sphi %s1446_s30, %s1769_s30   ;;  %s1378_s29 = sphi %s1444_s29, %s1768_s29   ;;  %s1374_s28 = sphi %s1442_s28, %s1767_s28   ;;  %s1370_s27 = sphi %s1440_s27, %s1766_s27   ;;  %s1366_s26 = sphi %s1438_s26, %s1765_s26   ;;  %s1362_s25 = sphi %s1436_s25, %s1774_s25   ;;  %s1358_s24 = sphi %s1434_s24, %s1773_s24   ;;  %s1354_s23 = sphi %s1432_s23, %s1772_s23   ;;  %s1350_s22 = sphi %s1430_s22, %s1771_s22   ;;  %s1346_s21 = sphi %s1428_s21, %s1770_s21  }
  0x10   : > { %1743 = sst [smem:[#allocation10_spill]] %s1378_s29  ;;  %s1028_s9 = sadd.s32 4294967294, %s1386_s7  }
  0x11   : > { %1744 = sst [smem:[#allocation11_spill]] %s1382_s30  ;;  %s35_s10 = sadd.s32 1, %s1378_s29 }
  0x12   : > { %s42_s11 = sadd.s32 1, %s1382_s30  ;;  %p36_p0 = scmp.ge.s32.totalorder %s35_s10, 4 }
  0x13   : > { %s176_s12 = sadd.s32 1, %s1366_s26  ;;  %p186_p1 = scmp.ne.s32.totalorder %s1366_s26, %s1362_s25 }
  0x14   : > { %p1490_p2 = scmp.eq.s32.totalorder %s1027_s8, 7  ;;  %s1776_s10 = smov (%p36_p0, %s35_s10), 0 }
  0x15   : > { %1746 = sst [smem:[#allocation12_spill]] %s1776_s10  ;;  %s1778_s11 = smov (!%p36_p0, %s42_s11), %s1382_s30 }
  0x16   : > { %p1499_p3 = por %p1490_p2, %p186_p1  ;;  %p192_p4 = scmp.ne.s32.totalorder %s1362_s25, %s1358_s24 }
  0x17   : > { %p44_p5 = scmp.ge.s32.totalorder %s1778_s11, 2  ;;  %p1505_p6 = scmp.eq.s32.totalorder %s1028_s9, 7 }
  0x18   : > { %s200_s16 = ssub.s32 %s1378_s29, %s1776_s10  ;;  %s206_s17 = sadd.s32 1, %s1354_s23 }
  0x19   : > { %s1780_s11 = smov (%p44_p5, %s1778_s11), 0  ;;  %p1516_p7 = por %p1505_p6, %p192_p4 }
  0x1a   : > { %1749 = sst [smem:[#allocation13_spill]] %s1780_s11  ;;  %p216_p8 = scmp.ne.s32.totalorder %s1354_s23, %s1350_s22 }
  0x1b   : > { %s1750_s18 = scalar_select %p1516_p7, 1, 0 }
  0x1c   : > { %s171_s19 = ssub.s32 %s1382_s30, %s1780_s11  ;;  %p222_p9 = scmp.ne.s32.totalorder %s1350_s22, %s1346_s21 }
  0x1d   : > { %p174_p10 = scmp.eq.s32.totalorder %s171_s19, 0  ;;  %s201_s20 = sor.u32 %s200_s16, %s171_s19 }
  0x1e   : > { %p204_p11 = scmp.eq.s32.totalorder %s201_s20, 0  ;;  %p1528_p12 = por %p216_p8, %p1490_p2 }
  0x1f   : > { %s1533_s9 = scalar_select %p174_p10, %s1366_s26, %s176_s12  }
  0x20   : > { %s1536_s10 = scalar_select %p204_p11, %s1354_s23, %s206_s17  }
  0x21   : > { %1752 = sst [smem:[#allocation14_spill]] %s1533_s9  ;;  %p1540_p13 = por %p222_p9, %p1505_p6 }
  0x22   : > { %p1031_p0 = scmp.ge.s32.totalorder %s1386_s7, 1  ;;  %p273_p1 = scmp.lt.s32.totalorder %s1386_s7, 9 }
  0x23   : > { %s1753_s29 = scalar_select %p1540_p13, 1, 0 }
  0x24   : > { %p274_p4 = pnand %p1031_p0, %p273_p1 }
  0x25   : > { %p324_p2 = scmp.lt.s32.totalorder (!%p274_p4), %s1370_s27, 3  ;;  %s1731_s13 = sand.u32 (!%p274_p4), 1, %s1362_s25  }
  0x26   : > { %277 = sbr.rel (%p274_p4) target bundleno = 1215 (0x4bf), region = 40  ;;  %s1551_s12 = sshll.u32 (!%p274_p4), %s1731_s13, 3 }
  0x27   : > { %p320_p5 = scmp.lt.s32.totalorder (!%p274_p4), %s1374_s28, 1  ;;  %s1754_s3 = sld [smem:[#allocation18_spill]] (!%p274_p4) }
  0x28   : > { %s1755_s1 = sld [smem:[#allocation16_spill]] (!%p274_p4)  ;;  %p1052_p6 = scmp.ne.s32.totalorder (!%p274_p4), %s1370_s27, 0 }
  0x29   : > { %s1756_s0 = sld [smem:[#allocation15_spill]] (!%p274_p4) }
  0x2a   : > { %s1757_s2 = sld [smem:[#allocation17_spill]] (!%p274_p4) }
  0x2b   : > { %v1388_v0 = vmov 0.0   ;;  %s1555_s15 = scalar_select %p324_p2, %s1370_s27, 3  ;;  %vm1389_vm0 = vmmov 0   ;;  %vm360_vm1 = vcmask 261120   ;;  %v356_v10 = vlaneseq }
  0x2c   : > { %1095 = vmatprep.subr.mxu1 %v1388_v0  ;;  %1084 = vmatprep.subr.mxu0 %v1388_v0  ;;  %s321_s26 = scalar_select %p320_p5, %s1374_s28, 1  ;;  %vm585_vm2 = vcmask 64512  }
  0x2d   : > { %1103 = vmatprep.mubr.msk.f32.mxu1 %vm1389_vm0, %v1388_v0  ;;  %1092 = vmatprep.mubr.msk.f32.mxu0 %vm1389_vm0, %v1388_v0  ;;  %s1132_s16 = smul.u32 96, %s1555_s15  ;;  %s1037_s17 = sshll.u32 %s1555_s15, 3  ;;  %v357_v11 = vshrl.u32 %v356_v10, 7 }
  0x2e   : > { %s1567_s13 = scalar_lea.vmem %s1754_s3, %s1037_s17  ;;  %s1034_s30 = sshll.u32 %s321_s26, 3 }
  0x2f   : > { %s1572_s9 = scalar_lea.vmem %s1755_s1, %s1132_s16  ;;  %s323_s17 = scalar_lea.vmem %s1756_s0, %s1034_s30  ;;  %v436_v12 = vsub.s32 1, %v357_v11  ;;  %v358_v14 = vsub.s32 0, %v357_v11  ;;  %v513_v36 = vsub.s32 2, %v357_v11 }
  0x30   : > { %v1041_v1 = vld [vmem:[%s1572_s9 + $0x38] sm:$0xff]  ;;  %v1040_v3 = vld [vmem:[%s1572_s9 + $0x30] sm:$0xff]  ;;  %v1039_v5 = vld [vmem:[%s1572_s9 + $0x28] sm:$0xff]  ;;  %s1036_s26 = sshll.u32 %s1555_s15, 2  ;;  %s312_s16 = scalar_lea.vmem [#allocation3], %s1551_s12 }
  0x31   : > { %v344_v2 = vld [vmem:[%s1572_s9 + $0x18] sm:$0xff]  ;;  %1096 = vmatpush3.msra.mxu1 %v1041_v1  ;;  %v343_v4 = vld [vmem:[%s1572_s9 + $0x10] sm:$0xff]  ;;  %v342_v6 = vld [vmem:[%s1572_s9 + $0x8] sm:$0xff]  ;;  %s332_s30 = scalar_lea.vmem %s1757_s2, %s1036_s26 }
  0x32   : > { %1085 = vmatpush3.msra.mxu0 %v344_v2  ;;  %1097 = vmatprep.subr.mxu1 %v1388_v0  ;;  %v1038_v7 = vld [vmem:[%s1572_s9 + $0x20] sm:$0xff]  ;;  %v1045_v23 = vld [vmem:[%s1572_s9 + $0x58] sm:$0xff]  ;;  %v1044_v24 = vld [vmem:[%s1572_s9 + $0x50] sm:$0xff] }
  0x33   : > { %1086 = vmatprep.subr.mxu0 %v1388_v0  ;;  %1098 = vmatpush3.msra.mxu1 %v1040_v3  ;;  %v341_v8 = vld [vmem:[%s1572_s9] sm:$0xff]  ;;  %v1043_v25 = vld [vmem:[%s1572_s9 + $0x48] sm:$0xff] }
  0x34   : > { %1087 = vmatpush3.msra.mxu0 %v343_v4  ;;  %1099 = vmatprep.subr.mxu1 %v1388_v0  ;;  %v337_v9 = vld [vmem:[%s323_s17] sm:$0xff] }
  0x35   : > { %1088 = vmatprep.subr.mxu0 %v1388_v0  ;;  %1100 = vmatpush3.msra.mxu1 %v1039_v5  ;;  %v355_v13 = vld [vmem:[%s332_s30] sm:$0x7] }
  0x36   : > { %1089 = vmatpush3.msra.mxu0 %v342_v6  ;;  %1101 = vmatprep.subr.mxu1 %v1388_v0  ;;  %v437_v15 = vrot.slane %v355_v13, %v436_v12  ;;  %v359_v16 = vrot.slane %v355_v13, %v358_v14  ;;  %v1042_v26 = vld [vmem:[%s1572_s9 + $0x40] sm:$0xff]  ;;  %v514_v38 = vrot.slane %v355_v13, %v513_v36  ;;  %s1735_s9 = sand.u32 1, %s1350_s22  }
  0x37   : > { %1090 = vmatprep.subr.mxu0 %v1388_v0  ;;  %1102 = vmatpush3.msra.mxu1 %v1038_v7  ;;  %s1622_s15 = sshll.u32 %s1735_s9, 3 }
  0x38   : > { %1091 = vmatpush3.msra.mxu0 %v341_v8  ;;  %1104 = vmatmul.mubr.msk.f32.vlgmr.msra.gmra.mxu1 %vm360_vm1, %v337_v9  ;;  %s1736_s11 = scalar_lea.vmem [#allocation5], %s1622_s15 }
  0x39   : > { %1093 = vmatmul.mubr.msk.f32.vlgmr.msra.gmra.mxu0 %vm360_vm1, %v337_v9  ;;  %1117 = vmatprep.subr.mxu1 %v1388_v0 }
  0x3a   : > { %1119 = vmatprep.mubr.msk.f32.mxu1 %vm1389_vm0, %v1388_v0  ;;  %1106 = vmatprep.subr.mxu0 %v1388_v0 }
  0x3b   : > { %1114 = vmatprep.mubr.msk.f32.mxu0 %vm1389_vm0, %v1388_v0  ;;  %1107 = vmatpush3.msra.mxu0 %v1045_v23 }
  0x3c   : > { %1108 = vmatprep.subr.mxu0 %v1388_v0 }
  0x3d   : > { %1109 = vmatpush3.msra.mxu0 %v1044_v24 }
  0x3e   : > { %1110 = vmatprep.subr.mxu0 %v1388_v0 }
  0x3f   : > { %1111 = vmatpush3.msra.mxu0 %v1043_v25 }
  0x40   : > { %1112 = vmatprep.subr.mxu0 %v1388_v0 }
  0x41   : > { %1113 = vmatpush3.msra.mxu0 %v1042_v26 }
  0x42   : > { %1115 = vmatmul.mubr.msk.f32.vlgmr.msra.gmra.mxu0 %vm360_vm1, %v337_v9 }
  0xf8   : > { %v507_v17 = vpop.f32.mrf.mxu1 }
  0xf9   : > { %v430_v18 = vpop.f32.mrf.mxu0  ;;  %v508_v19 = vadd.f32 %v507_v17, %v437_v15 }
  0xfa   : > { %v431_v20 = vadd.f32 %v430_v18, %v359_v16  ;;  %v1105_v21 = vpop.f32.mrf.mxu1 }
  0xfb   : > { %v1094_v22 = vpop.f32.mrf.mxu0  ;;  %1118 = vmatpush3.xpose.msk.msra.mxu1 %vm585_vm2, %v508_v19 }
  0xfc   : > { %1122 = vmatprep.subr.mxu1 %v1388_v0 }
  0xfe   : > { %1120 = vmatmul.mubr.msk.f32.vlgmr.msra.gmra.mxu1 %vm585_vm2, %v431_v20 }
  0xff   : > { %1124 = vmatprep.mubr.msk.f32.mxu1 %vm1389_vm0, %v1388_v0 }
 0x102   : > { %v581_v37 = vpop.f32.mrf.mxu0 }
 0x103   : > { %v582_v40 = vadd.f32 %v581_v37, %v514_v38 }
 0x104   : > { %v1116_v39 = vpop.f32.mrf.mxu0 }
 0x105   : > { %1123 = vmatpush3.msra.mxu1 %v582_v40 }
 0x1be   : > { %v658_v27 = vpop.f32.mrf.mxu1 }
 0x1bf   : > { %v662_v28 = vmul.f32 0.35355338, %v658_v27 }
 0x1c0   : > { %v1121_v29 = vpop.f32.mrf.mxu1 }
 0x1c1   : > { %v663_v30 = vsel %vm585_vm2, %v662_v28, -inf }
 0x1c2   : > { %664 = vmax.xlane.f32.xlu0 %v663_v30 }
 0x24b   : > { %v665_v31 = vpop.xlane.xlu0 %664 }
 0x24c   : > { %v666_v32 = vsub.f32 %v662_v28, %v665_v31 }
 0x24e   : > { %v667_v33 = vmul.f32 1.442695, %v666_v32 }
 0x250   : > { %1236 = vpow2.f32 %v667_v33 }
 0x25d   : > { %v1237_v34 = vpop.eup %1236 }
 0x25e   : > { %v669_v35 = vsel %vm585_vm2, %v1237_v34, 0.0 }
 0x25f   : > { %670 = vadd.xlane.f32.xlu0 %v669_v35 }
 0x2e8   : > { %v671_v41 = vpop.xlane.xlu0 %670 }
 0x2e9   : > { %1238 = vrcp.f32 %v671_v41 }
 0x2f6   : > { %v1239_v42 = vpop.eup %1238 }
 0x2f7   : > { %v673_v43 = vmul.f32 %v1239_v42, %v1237_v34 }
 0x2f9   : > { %674 = vst.msk [vmem:[%s1736_s11] sm:$0xff] %vm585_vm2, %v673_v43  ;;  %1125 = vmatmul.mubr.msk.f32.vlgmr.msra.gmra.mxu1 %vm585_vm2, %v673_v43 }
 0x3b7   : > { %751 = sbr.rel (%p1052_p6) target bundleno = 958 (0x3be), region = 44 }
 0x3b9   : > { %v744_v44 = vpop.f32.mrf.mxu1 }
 0x3bb   : > { %v1126_v45 = vpop.f32.mrf.mxu1 }
 0x3bc   : > { %v1390_v46 = vmov 0.0  }
 0x3bd   : > { %752 = vst.msk [vmem:[#allocation2] sm:$0xff] %vm360_vm1, %v1390_v46 }
 0x3be PF: > { %1127 = vmatprep.subr.mxu0 %v1388_v0  ;;  %v754_v47 = vld [vmem:[%s1567_s13] sm:$0xff]  ;;  %1129 = vmatprep.mubr.msk.f32.mxu0 %vm1389_vm0, %v1388_v0  ;;  %p1054_p8 = scmp.ne.s32.totalorder %s1370_s27, 3 }
 0x3bf   : > { %1128 = vmatpush3.msra.mxu0 %v754_v47  ;;  %s1758_s4 = sld [smem:[#allocation19_spill]] (!%p1054_p8) }
 0x3c0   : > { %1130 = vmatmul.mubr.msk.f32.vlgmr.msra.gmra.mxu0 %vm585_vm2, %v744_v44 }
 0x3c4   : > { %v753_v48 = vld [vmem:[#allocation2] sm:$0xff] }
 0x47f   : > { %833 = sbr.rel (%p1054_p8) target bundleno = 1166 (0x48e), region = 48 }
 0x480   : > { %v824_v49 = vpop.f32.mrf.mxu0 }
 0x481   : > { %v828_v50 = vadd.f32 %v824_v49, %v753_v48 }
 0x482   : > { %v1131_v51 = vpop.f32.mrf.mxu0 }
 0x483   : > { %829 = vst.msk [vmem:[#allocation2] sm:$0xff] %vm360_vm1, %v828_v50 }
 0x484   : > { %v1055_v53 = vld [vmem:[%s1758_s4] ss:$0 sm:$0xff] }
 0x48a   : > { %v834_v52 = vld [vmem:[#allocation2] sm:$0xff] }
 0x48b   : > { %v842_v54 = vadd.f32 %v1055_v53, %v834_v52 }
 0x48d   : > { %843 = vst.msk [vmem:[%s312_s16] sm:$0xff] %vm360_vm1, %v842_v54 }
 0x48e PF: > { %s1058_s13 = sshll.u32 %s1374_s28, 7  ;;  %s864_s30 = sshll.u32 %s312_s16, 4  ;;  %s865_s30 = int_to_ptr.vmem [resolvable:$true] %s864_s30 }
 0x48f   : > { %s862_s20 = scalar_lea.hbm %s1727_s5, %s1058_s13  ;;  %s1759_s9 = sand.u32 1, %s1362_s25  }
 0x490   : > { %s845_s11 = scalar_lea.sflag [#allocation4], %s1759_s9  ;;  %s1240_s0 = scalar_lea.vmem %s865_s30, 128 }
 0x491   : > { %p1241_p9 = scmp.ne.s32.totalorder %s865_s30, %s1240_s0  ;;  %s1391_s12 = smov [#allocation3]  }
 0x492   : > { %s1244_s17 = sshll.u32 %s1391_s12, 4  ;;  %s1245_s17 = int_to_ptr.vmem [resolvable:$false] %s1244_s17 }
 0x493   : > { %p1242_p10 = pnand %p1241_p9, %p1499_p3  ;;  %s1246_s1 = scalar_lea.vmem %s1245_s17, 256 }
 0x494   : > { %p1247_p0 = scmp.lt.s32.totalorder %s865_s30, %s1245_s17  ;;  %p1248_p1 = scmp.lt.s32.totalorder %s1246_s1, %s1240_s0 }
 0x495   : > { %p1243_p11 = pneg %p1242_p10 }
 0x496   : > { %p1249_p4 = por %p1248_p1, %p1247_p0 }
 0x498   : > { %p1250_p2 = pnand %p1249_p4, %p1243_p11 }
 0x49a   : > { %1253 = shalt.err (!%p1250_p2)
}
 0x49b   : > { %s1254_s26 = scalar_lea.hbm %s862_s20, 128  ;;  %s1258_s13 = scalar_lea.hbm %s1727_s5, 256 }
 0x49c   : > { %p1255_p5 = scmp.ne.s32.totalorder %s862_s20, %s1254_s26  ;;  %p1259_p9 = scmp.lt.s32.totalorder %s862_s20, %s1727_s5 }
 0x49d   : > { %p1260_p10 = scmp.lt.s32.totalorder %s1258_s13, %s1254_s26 }
 0x49e   : > { %p1256_p6 = pnand %p1255_p5, %p1499_p3 }
 0x49f   : > { %p1261_p13 = por %p1260_p10, %p1259_p9 }
 0x4a0   : > { %p1257_p8 = pneg %p1256_p6 }
 0x4a2   : > { %p1262_p7 = pnand %p1261_p13, %p1257_p8 }
 0x4a4   : > { %1265 = shalt.err (!%p1262_p7)
}
 0x4a5   : > { %1133 = dma.vmem_to_hbm [thread:$0]  (%p1499_p3), %s865_s30, 128, %s862_s20, %s845_s11  }
 0x4a6   : > { %s1059_s0 = sshll.u32 %s1374_s28, 2  ;;  %s1760_s1 = scalar_lea.vmem [#allocation5], %s1622_s15 }
 0x4a7   : > { %s880_s12 = sshll.u32 %s1760_s1, 4  ;;  %s876_s17 = sadd.s32 %s1370_s27, %s1059_s0  ;;  %s881_s12 = int_to_ptr.vmem [resolvable:$true] %s880_s12 }
 0x4a8   : > { %s1060_s9 = sshll.u32 %s876_s17, 7  ;;  %s1761_s13 = sand.u32 1, %s1350_s22  }
 0x4a9   : > { %s878_s26 = scalar_lea.hbm %s1728_s6, %s1060_s9  ;;  %s850_s19 = scalar_lea.sflag [#allocation6], %s1761_s13 }
 0x4aa   : > { %s1266_s3 = scalar_lea.vmem %s881_s12, 128  ;;  %s1392_s14 = smov [#allocation5]  }
 0x4ab   : > { %p1267_p7 = scmp.ne.s32.totalorder %s881_s12, %s1266_s3  ;;  %s1270_s4 = sshll.u32 %s1392_s14, 4  ;;  %s1271_s4 = int_to_ptr.vmem [resolvable:$false] %s1270_s4 }
 0x4ac   : > { %s1272_s28 = scalar_lea.vmem %s1271_s4, 256  ;;  %p1273_p3 = scmp.lt.s32.totalorder %s881_s12, %s1271_s4 }
 0x4ad   : > { %p1268_p13 = pnand %p1267_p7, %p1528_p12  ;;  %p1274_p0 = scmp.lt.s32.totalorder %s1272_s28, %s1266_s3 }
 0x4af   : > { %p1269_p11 = pneg %p1268_p13  ;;  %p1275_p1 = por %p1274_p0, %p1273_p3 }
 0x4b1   : > { %p1276_p4 = pnand %p1275_p1, %p1269_p11 }
 0x4b3   : > { %1279 = shalt.err (!%p1276_p4)
}
 0x4b4   : > { %s1280_s27 = scalar_lea.hbm %s878_s26, 128  ;;  %s1284_s20 = scalar_lea.hbm %s1728_s6, 1024 }
 0x4b5   : > { %p1281_p2 = scmp.ne.s32.totalorder %s878_s26, %s1280_s27  ;;  %p1285_p8 = scmp.lt.s32.totalorder %s878_s26, %s1728_s6 }
 0x4b6   : > { %p1286_p9 = scmp.lt.s32.totalorder %s1284_s20, %s1280_s27 }
 0x4b7   : > { %p1282_p5 = pnand %p1281_p2, %p1528_p12 }
 0x4b8   : > { %p1287_p10 = por %p1286_p9, %p1285_p8 }
 0x4b9   : > { %p1283_p6 = pneg %p1282_p5 }
 0x4bb   : > { %p1288_p7 = pnand %p1287_p10, %p1283_p6 }
 0x4bd   : > { %1291 = shalt.err (!%p1288_p7)
}
 0x4be   : > { %1134 = dma.vmem_to_hbm [thread:$0]  (%p1528_p12), %s881_s12, 128, %s878_s26, %s850_s19  }
 0x4bf PF: > { %p1144_p13 = scmp.ge.s32.totalorder %s1386_s7, 2  ;;  %s892_s3 = sand.u32 1, %s1358_s24  }
 0x4c0   : > { %p1762_p11 = scmp.ne.s32.totalorder %s1750_s18, 0  ;;  %s893_s4 = scalar_lea.sflag [#allocation4], %s892_s3 }
 0x4c2   : > { %p1138_p3 = pnand %p1144_p13, %p1762_p11 }
 0x4c4   : > { %p1139_p0 = pneg %p1138_p3 }
 0x4c6   : > { %1337 = dma.done.wait (%p1139_p0), %s893_s4, 128  }
 0x4c7   : > { %1339 = vsyncadd (%p1139_p0), %s893_s4, 4294967168  ;;  %s901_s1 = sand.u32 1, %s1346_s21   ;;  %p1763_p1 = scmp.ne.s32.totalorder %s1753_s29, 0 }
 0x4c8   : > { %s902_s8 = scalar_lea.sflag [#allocation6], %s901_s1 }
 0x4c9   : > { %p1141_p4 = pnand %p1144_p13, %p1763_p1 }
 0x4cb   : > { %p1142_p2 = pneg %p1141_p4 }
 0x4cd   : > { %1341 = dma.done.wait (%p1142_p2), %s902_s8, 128  }
 0x4ce   : > { %1343 = vsyncadd (%p1142_p2), %s902_s8, 4294967168  ;;  %s23_s7 = sadd.s32 1, %s1386_s7   ;;  %s1764_s18 = sld [smem:[#allocation9_spill]] }
 0x4cf   : > { %p20_p12 = scmp.ge.s32.totalorder %s23_s7, 10   ;;  %s1765_s26 = sld [smem:[#allocation14_spill]] }
 0x4d0   : > { %s1766_s27 = sld [smem:[#allocation10_spill]]  ;;  %s1770_s21 = smov %s1350_s22 }
 0x4d1   : > { %s1767_s28 = sld [smem:[#allocation11_spill]]  ;;  %s1771_s22 = smov %s1354_s23 }
 0x4d2   : > { %s1768_s29 = sld [smem:[#allocation12_spill]]  ;;  %s1772_s23 = smov %s1536_s10 }
 0x4d3   : > { %s1769_s30 = sld [smem:[#allocation13_spill]]  ;;  %s1773_s24 = smov %s1362_s25 }
 0x4d4   : > { %s1774_s25 = smov %s1764_s18  ;;  %22 = sbr.rel (!%p20_p12) target bundleno = 15 (0xf), region = 112 }
 0x4d9   :  { %907 = vsyncpa [#allocation4], 1 }
 0x4da   :  { %909 = vsyncpa [#allocation4 + $0x1], 1 }
 0x4db   :  { %910 = vsyncpa [#allocation6], 1 }
 0x4dc   :  { %912 = vsyncpa [#allocation6 + $0x1], 1 }

</bundles_post_ra>
